<compile_context>
chip_gen: v5e
topology: v5e:2x2
jax: 0.10.0
libtpu: 0.0.40
codegen_flags: <defaults>
</compile_context>

<pallas_src>
import functools

import jax
import jax.numpy as jnp
from jax.experimental import pallas as pl
from jax.experimental.pallas import tpu as pltpu


def _round_up(x, m):
    return ((x + m - 1) // m) * m


# -----------------------------------------------------------------------------
# Pallas kernel: fused 1x1 conv (lane-dense matmuls over re/im) + BN bias + ReLU
# -----------------------------------------------------------------------------
def _conv_bn_relu_kernel(xr_ref, xi_ref, wr_ref, wi_ref, bias_ref, o_ref):
    # xr_ref/xi_ref: (Cin,  Tpx)  real / imag frequency channels x pixel tile
    # wr_ref/wi_ref: (Nout, Cin)  BN-scale-folded 1x1 conv weights (re / im cols)
    # bias_ref:      (Nout, 1)    beta - mean * gamma / sqrt(var + eps)
    # o_ref:         (Nout, Tpx)  [real half | imag half] output channels
    #
    # NOTE(precision): the kernel is HBM-bandwidth bound, so if tighter-than-
    # default MXU accuracy is ever required at large Cin, adding
    # precision=jax.lax.Precision.HIGHEST here is nearly free.  The validation
    # tolerance below consciously accommodates the default f32 matmul path.
    y = jnp.dot(wr_ref[...], xr_ref[...], preferred_element_type=jnp.float32)
    y = y + jnp.dot(wi_ref[...], xi_ref[...], preferred_element_type=jnp.float32)
    y = y + bias_ref[...]
    o_ref[...] = jnp.maximum(y, 0.0).astype(o_ref.dtype)


def _vmem_budgets():
    """Return (working-set budget bytes, vmem_limit_bytes) per TPU generation."""
    mib = 1024 * 1024
    phys = None
    try:
        phys = getattr(pltpu.get_tpu_info(), "vmem_capacity_bytes", None)
    except Exception:
        phys = None
    if phys is None:
        phys = 64 * mib  # unknown -> assume the smallest (v7x-class) VMEM
    if phys <= 64 * mib:
        # v7x-class: 64 MiB physical per TensorCore -> keep the double-buffered
        # working set well under it and leave headroom for Mosaic scratch.
        return 40 * mib, 48 * mib
    # v5e / v6e: 128 MiB physical; only the 16/32 MiB scoped default is tight,
    # so raise the limit explicitly and budget ~28 MiB of pipelined tiles.
    return 28 * mib, 64 * mib


def conv_bn_relu_pallas(x_re, x_im, w_re, w_im, bias):
    """x_re/x_im: (N, Cin, P) f32, w_re/w_im: (Nout, Cin) f32, bias: (Nout, 1) f32
    -> (N, Nout, P) f32 with output channels ordered [real half | imag half]."""
    N, Cin, P = x_re.shape
    Nout = w_re.shape[0]

    work_budget, vmem_limit = _vmem_budgets()

    # Bytes per pixel of the double-buffered per-step tiles: two input tiles
    # (Cin rows each) + one output tile (Nout rows), f32, x2 pipeline buffers.
    bytes_per_px = (2 * Cin + Nout) * 4 * 2
    # Constant-index weight/bias blocks still get double-buffered by BlockSpec;
    # include them plus ~1 MiB of allowance for Mosaic internal scratch.
    fixed_bytes = 2 * (2 * Nout * Cin + Nout) * 4 + (1 << 20)
    avail = max(work_budget - fixed_bytes, 128 * bytes_per_px)
    max_tile_px = max(128, (avail // bytes_per_px) // 128 * 128)

    if P <= max_tile_px:
        tile_px = P                      # full extent: always a legal block
        num_tiles = 1
    else:
        # Balanced tiles (all lane-dense, no mostly-masked tail tile).
        num_tiles = pl.cdiv(P, max_tile_px)
        tile_px = _round_up(pl.cdiv(P, num_tiles), 128)
        num_tiles = pl.cdiv(P, tile_px)

    # v7x has 2 TensorCores sharded over "parallel" grid axes: make sure a
    # batch-1 call still exposes >= 2 blocks (harmless on 1-TC v5e/v6e).
    if N == 1 and num_tiles == 1 and P > 128:
        tile_px = _round_up(pl.cdiv(P, 2), 128)
        num_tiles = pl.cdiv(P, tile_px)

    grid = (N, num_tiles)

    cost = pl.CostEstimate(
        flops=4 * N * Nout * Cin * P,  # two (Nout,Cin)@(Cin,P) matmuls per image
        transcendentals=0,
        bytes_accessed=(2 * N * Cin * P + N * Nout * P + 2 * Nout * Cin + Nout) * 4,
    )

    return pl.pallas_call(
        _conv_bn_relu_kernel,
        out_shape=jax.ShapeDtypeStruct((N, Nout, P), x_re.dtype),
        grid=grid,
        in_specs=[
            pl.BlockSpec((None, Cin, tile_px), lambda n, p: (n, 0, p)),
            pl.BlockSpec((None, Cin, tile_px), lambda n, p: (n, 0, p)),
            pl.BlockSpec((Nout, Cin), lambda n, p: (0, 0)),
            pl.BlockSpec((Nout, Cin), lambda n, p: (0, 0)),
            pl.BlockSpec((Nout, 1), lambda n, p: (0, 0)),
        ],
        out_specs=pl.BlockSpec((None, Nout, tile_px), lambda n, p: (n, 0, p)),
        compiler_params=pltpu.CompilerParams(
            dimension_semantics=("parallel", "parallel"),
            vmem_limit_bytes=vmem_limit,
        ),
        cost_estimate=cost,
    )(x_re, x_im, w_re, w_im, bias)


# -----------------------------------------------------------------------------
# FourierUnit forward
# -----------------------------------------------------------------------------
@functools.partial(jax.jit, static_argnames=("eps",))
def fourier_unit_forward(x, conv_w, bn_gamma, bn_beta, bn_mean, bn_var, eps=1e-5):
    """x: (N, Cin, H, W) float32 (NCHW, matching the PyTorch module)."""
    N, Cin, H, W = x.shape
    Nout = conv_w.shape[0]
    Cout = Nout // 2

    # TODO(synk): rfft2/irfft2 have no Pallas/Mosaic primitive on TPU; they stay in XLA.
    ffted = jnp.fft.rfft2(x, norm="ortho")                 # (N, Cin, H, Wf) complex64
    Wf = ffted.shape[-1]
    P = H * Wf

    # Real / imag passed as two separate kernel inputs: the concatenated
    # (N, 2Cin, P) slab is never materialized in HBM.
    x_re = jnp.real(ffted).reshape(N, Cin, P).astype(jnp.float32)
    x_im = jnp.imag(ffted).reshape(N, Cin, P).astype(jnp.float32)

    # PyTorch 1x1 conv weight layout: input channels interleaved
    # [c0_re, c0_im, c1_re, ...] and output channels interleaved likewise.
    # Permute the tiny (Nout, 2Cin) matrix once:
    #   rows -> kernel emits [all-real half | all-imag half] output channels,
    #   cols -> split into the real-column / imag-column halves fed to the kernel.
    wmat = conv_w.reshape(Nout, 2 * Cin).astype(jnp.float32)
    out_perm = 2 * (jnp.arange(Nout) % Cout) + (jnp.arange(Nout) // Cout)
    wmat = wmat[out_perm]

    # Fold eval-mode BatchNorm: scale into the weights, bias as per-channel add.
    inv_std = 1.0 / jnp.sqrt(bn_var + eps)
    scale = (bn_gamma * inv_std)[out_perm].astype(jnp.float32)
    bias = (bn_beta - bn_mean * bn_gamma * inv_std)[out_perm].astype(jnp.float32)
    wmat = wmat * scale[:, None]
    w_re = wmat[:, 0::2]                                   # (Nout, Cin)
    w_im = wmat[:, 1::2]                                   # (Nout, Cin)
    bias_col = bias[:, None]                               # (Nout, 1)

    y = conv_bn_relu_pallas(x_re, x_im, w_re, w_im, bias_col)   # (N, Nout, P)

    # [real half | imag half] -> complex; reshape back to (N, Cout, H, Wf) is free.
    yc = jax.lax.complex(y[:, :Cout], y[:, Cout:]).reshape(N, Cout, H, Wf)
    out = jnp.fft.irfft2(yc, s=(H, W), norm="ortho")       # (N, Cout, H, W)
    return out.astype(x.dtype)


# -----------------------------------------------------------------------------
# Pure-JAX reference (no Pallas), mirroring the PyTorch module exactly
# -----------------------------------------------------------------------------
def fourier_unit_reference(x, conv_w, bn_gamma, bn_beta, bn_mean, bn_var, eps=1e-5):
    N, Cin, H, W = x.shape
    ffted = jnp.fft.rfft2(x, norm="ortho")
    Wf = ffted.shape[-1]
    fr = jnp.stack([jnp.real(ffted), jnp.imag(ffted)], axis=2).reshape(N, 2 * Cin, H, Wf)
    Nout = conv_w.shape[0]
    wmat = conv_w.reshape(Nout, 2 * Cin)
    conv = jnp.einsum("nkhw,ok->nohw", fr, wmat)
    inv_std = 1.0 / jnp.sqrt(bn_var + eps)
    bn = (conv - bn_mean[None, :, None, None]) * inv_std[None, :, None, None]
    bn = bn * bn_gamma[None, :, None, None] + bn_beta[None, :, None, None]
    act = jnp.maximum(bn, 0.0)
    Cout = Nout // 2
    y = act.reshape(N, Cout, 2, H, Wf)
    yc = jax.lax.complex(y[:, :, 0], y[:, :, 1])
    return jnp.fft.irfft2(yc, s=(H, W), norm="ortho")


if __name__ == "__main__":
    # Small shapes consistent with the module: in_channels = out_channels = 4.
    N, Cin, H, W = 2, 4, 16, 16
    Cout = 4

    key = jax.random.PRNGKey(0)
    k_x, k_w, k_g, k_b, k_m, k_v = jax.random.split(key, 6)

    x = jax.random.normal(k_x, (N, Cin, H, W), dtype=jnp.float32)

    # Deterministic synthetic parameters (shapes from the module __init__).
    conv_w = jax.random.normal(k_w, (2 * Cout, 2 * Cin, 1, 1), dtype=jnp.float32) * 0.1
    bn_gamma = 1.0 + 0.1 * jax.random.normal(k_g, (2 * Cout,), dtype=jnp.float32)
    bn_beta = 0.1 * jax.random.normal(k_b, (2 * Cout,), dtype=jnp.float32)
    bn_mean = 0.1 * jax.random.normal(k_m, (2 * Cout,), dtype=jnp.float32)
    bn_var = jnp.abs(1.0 + 0.1 * jax.random.normal(k_v, (2 * Cout,), dtype=jnp.float32))

    out = fourier_unit_forward(x, conv_w, bn_gamma, bn_beta, bn_mean, bn_var)
    out = jax.block_until_ready(out)

    ref = fourier_unit_reference(x, conv_w, bn_gamma, bn_beta, bn_mean, bn_var)
    assert out.shape == (N, Cout, H, W), out.shape
    # Tolerance consciously accommodates the MXU's default f32 matmul precision
    # (see precision note in the kernel); semantic errors would be orders of
    # magnitude larger than this.
    assert jnp.allclose(out, ref, atol=2e-3, rtol=2e-3), "Pallas result mismatch vs reference"

    print("KERNEL_OK")
</pallas_src>

<mosaic_0001>
module attributes {stable_mosaic.version = 11 : i64} {
  func.func @_conv_bn_relu_kernel(%arg0: i32, %arg1: i32, %arg2: memref<1x4x144xf32, #tpu.memory_space<vmem>>, %arg3: memref<1x4x144xf32, #tpu.memory_space<vmem>>, %arg4: memref<8x4xf32, #tpu.memory_space<vmem>>, %arg5: memref<8x4xf32, #tpu.memory_space<vmem>>, %arg6: memref<8x1xf32, #tpu.memory_space<vmem>>, %arg7: memref<1x8x144xf32, #tpu.memory_space<vmem>>) attributes {dimension_semantics = [#tpu.dimension_semantics<parallel>, #tpu.dimension_semantics<parallel>], iteration_bounds = array<i64: 2, 1>, scalar_prefetch = 0 : i64, scratch_operands = 0 : i64, tpu.core_type = #tpu.core_type<tc>, window_params = [{transform_indices = @transform_0, window_bounds = array<i64: 1, 4, 144>}, {transform_indices = @transform_1, window_bounds = array<i64: 1, 4, 144>}, {pipeline_mode = #tpu.pipeline_mode<synchronous>, transform_indices = @transform_2, window_bounds = array<i64: 8, 4>}, {pipeline_mode = #tpu.pipeline_mode<synchronous>, transform_indices = @transform_3, window_bounds = array<i64: 8, 4>}, {pipeline_mode = #tpu.pipeline_mode<synchronous>, transform_indices = @transform_4, window_bounds = array<i64: 8, 1>}, {transform_indices = @transform_5, window_bounds = array<i64: 1, 8, 144>}]} {
    %c0 = arith.constant 0 : index
    %c0_0 = arith.constant 0 : index
    %0 = vector.load %arg4[%c0, %c0_0] : memref<8x4xf32, #tpu.memory_space<vmem>>, vector<8x4xf32>
    %c0_1 = arith.constant 0 : index
    %c0_2 = arith.constant 0 : index
    %c0_3 = arith.constant 0 : index
    %1 = vector.load %arg2[%c0_1, %c0_2, %c0_3] : memref<1x4x144xf32, #tpu.memory_space<vmem>>, vector<1x4x144xf32>
    %2 = vector.shape_cast %1 : vector<1x4x144xf32> to vector<4x144xf32>
    %cst = arith.constant dense<0.000000e+00> : vector<8x144xf32>
    %3 = tpu.matmul %0, %2, %cst {dimension_numbers = #tpu.dot_dimension_numbers<[1], [0], [0], [1], [0, 0, 1, 1], [], []>} : vector<8x4xf32>, vector<4x144xf32>, vector<8x144xf32> -> vector<8x144xf32>
    %c0_4 = arith.constant 0 : index
    %c0_5 = arith.constant 0 : index
    %4 = vector.load %arg5[%c0_4, %c0_5] : memref<8x4xf32, #tpu.memory_space<vmem>>, vector<8x4xf32>
    %c0_6 = arith.constant 0 : index
    %c0_7 = arith.constant 0 : index
    %c0_8 = arith.constant 0 : index
    %5 = vector.load %arg3[%c0_6, %c0_7, %c0_8] : memref<1x4x144xf32, #tpu.memory_space<vmem>>, vector<1x4x144xf32>
    %6 = vector.shape_cast %5 : vector<1x4x144xf32> to vector<4x144xf32>
    %cst_9 = arith.constant dense<0.000000e+00> : vector<8x144xf32>
    %7 = tpu.matmul %4, %6, %cst_9 {dimension_numbers = #tpu.dot_dimension_numbers<[1], [0], [0], [1], [0, 0, 1, 1], [], []>} : vector<8x4xf32>, vector<4x144xf32>, vector<8x144xf32> -> vector<8x144xf32>
    %8 = arith.addf %3, %7 : vector<8x144xf32>
    %c0_10 = arith.constant 0 : index
    %c0_11 = arith.constant 0 : index
    %9 = vector.load %arg6[%c0_10, %c0_11] : memref<8x1xf32, #tpu.memory_space<vmem>>, vector<8x1xf32>
    %10 = vector.broadcast %9 : vector<8x1xf32> to vector<8x144xf32>
    %11 = arith.addf %8, %10 : vector<8x144xf32>
    %cst_12 = arith.constant 0.000000e+00 : f32
    %12 = vector.broadcast %cst_12 : f32 to vector<8x144xf32>
    %13 = arith.maximumf %11, %12 : vector<8x144xf32>
    %c0_13 = arith.constant 0 : index
    %c0_14 = arith.constant 0 : index
    %c0_15 = arith.constant 0 : index
    %14 = vector.load %arg7[%c0_13, %c0_14, %c0_15] : memref<1x8x144xf32, #tpu.memory_space<vmem>>, vector<1x8x144xf32>
    %15 = vector.shape_cast %14 : vector<1x8x144xf32> to vector<8x144xf32>
    %16 = vector.shape_cast %13 : vector<8x144xf32> to vector<1x8x144xf32>
    tpu.vector_store %arg7[%c0_13, %c0_14, %c0_15], %16 {strides = array<i32>} : memref<1x8x144xf32, #tpu.memory_space<vmem>>, vector<1x8x144xf32>,
    return
  }
  func.func @transform_0(%arg0: i32, %arg1: i32) -> (i32, i32, i32) {
    %c0_i32 = arith.constant 0 : i32
    %c0_i32_0 = arith.constant 0 : i32
    return %arg0, %c0_i32, %arg1 : i32, i32, i32
  }
  func.func @transform_1(%arg0: i32, %arg1: i32) -> (i32, i32, i32) {
    %c0_i32 = arith.constant 0 : i32
    %c0_i32_0 = arith.constant 0 : i32
    return %arg0, %c0_i32, %arg1 : i32, i32, i32
  }
  func.func @transform_2(%arg0: i32, %arg1: i32) -> (i32, i32) {
    %c0_i32 = arith.constant 0 : i32
    %c0_i32_0 = arith.constant 0 : i32
    %c0_i32_1 = arith.constant 0 : i32
    return %c0_i32, %c0_i32_0 : i32, i32
  }
  func.func @transform_3(%arg0: i32, %arg1: i32) -> (i32, i32) {
    %c0_i32 = arith.constant 0 : i32
    %c0_i32_0 = arith.constant 0 : i32
    %c0_i32_1 = arith.constant 0 : i32
    return %c0_i32, %c0_i32_0 : i32, i32
  }
  func.func @transform_4(%arg0: i32, %arg1: i32) -> (i32, i32) {
    %c0_i32 = arith.constant 0 : i32
    %c0_i32_0 = arith.constant 0 : i32
    %c0_i32_1 = arith.constant 0 : i32
    return %c0_i32, %c0_i32_0 : i32, i32
  }
  func.func @transform_5(%arg0: i32, %arg1: i32) -> (i32, i32, i32) {
    %c0_i32 = arith.constant 0 : i32
    %c0_i32_0 = arith.constant 0 : i32
    return %arg0, %c0_i32, %arg1 : i32, i32, i32
  }
}

</mosaic_0001>

<bundles_post_ra>
// kernel: reverse.0
= control target key start
LH: loop header
LB: loop body
LE: loop exit
PB: predicated region body
PF: predicated region fallthrough
CT: control target
= control target key end

     0   :  { %v72_v3 = vlaneseq  ;;  %v65_v6 = vld [vmem:[#allocation0 + $0x7] ss:$-1 sm:$0xff]  ;;  %v79_v8 = vld [vmem:[#allocation0 + $0x17] ss:$-1 sm:$0xff]  ;;  %s331_s0 = inlined_call_operand.vmem [shape: f32[2,4,16,7], index: 0, kind: input, shape index: {}]   ;;  %s332_s1 = inlined_call_operand.vmem [shape: f32[2,4,16,7], index: 1, kind: output, shape index: {}]  }
   0x1   :  { %v45_v0 = vld [vmem:[%s331_s0] sm:$0xff]  ;;  %v47_v1 = vld [vmem:[%s331_s0 + $0x8] sm:$0xff]  ;;  %v49_v2 = vld [vmem:[%s331_s0 + $0x10] sm:$0xff]  ;;  %v66_v12 = vrot.slane %v65_v6, 1  ;;  %v80_v13 = vrot.slane %v79_v8, 1 }
   0x2   :  { %46 = vst [vmem:[#allocation0 + $0x8] sm:$0xff] %v45_v0  ;;  %v51_v4 = vld [vmem:[%s331_s0 + $0x18] sm:$0xff]  ;;  %v53_v5 = vld [vmem:[%s331_s0 + $0x20] sm:$0xff]  ;;  %v55_v7 = vld [vmem:[%s331_s0 + $0x28] sm:$0xff]  ;;  %v73_v10 = vshrl.u32 %v72_v3, 7 }
   0x3   :  { %48 = vst [vmem:[#allocation0 + $0x18] sm:$0xff] %v47_v1  ;;  %v57_v9 = vld [vmem:[%s331_s0 + $0x30] sm:$0xff]  ;;  %v59_v11 = vld [vmem:[%s331_s0 + $0x38] sm:$0xff]  ;;  %v93_v14 = vld [vmem:[#allocation0 + $0x27] ss:$-1 sm:$0xff] }
   0x4   :  { %50 = vst [vmem:[#allocation0 + $0x28] sm:$0xff] %v49_v2  ;;  %vm74_vm0 = vcmp.lt.s32.totalorder %v73_v10, 7  ;;  %v107_v16 = vld [vmem:[#allocation0 + $0x37] ss:$-1 sm:$0xff]  ;;  %v94_v19 = vrot.slane %v93_v14, 1 }
   0x5   :  { %52 = vst [vmem:[#allocation0 + $0x38] sm:$0xff] %v51_v4  ;;  %v121_v22 = vld [vmem:[#allocation0 + $0x47] ss:$-1 sm:$0xff]  ;;  %v108_v24 = vrot.slane %v107_v16, 1  ;;  %v135_v28 = vld [vmem:[#allocation0 + $0x57] ss:$-1 sm:$0xff] }
   0x6   :  { %54 = vst [vmem:[#allocation0 + $0x48] sm:$0xff] %v53_v5  ;;  %v122_v29 = vrot.slane %v121_v22, 1  ;;  %v149_v32 = vld [vmem:[#allocation0 + $0x67] ss:$-1 sm:$0xff]  ;;  %v136_v33 = vrot.slane %v135_v28, 1 }
   0x7   :  { %56 = vst [vmem:[#allocation0 + $0x58] sm:$0xff] %v55_v7  ;;  %v163_v36 = vld [vmem:[#allocation0 + $0x77] ss:$-1 sm:$0xff]  ;;  %v150_v37 = vrot.slane %v149_v32, 1 }
   0x8   :  { %58 = vst [vmem:[#allocation0 + $0x68] sm:$0xff] %v57_v9  ;;  %v164_v40 = vrot.slane %v163_v36, 1 }
   0x9   :  { %60 = vst [vmem:[#allocation0 + $0x78] sm:$0xff] %v59_v11  ;;  %v70_v15 = vld [vmem:[#allocation0 + $0xf] ss:$-1 sm:$0xff] }
   0xa   :  { %67 = vst [vmem:[#allocation1] sm:$0xff] %v66_v12  ;;  %v71_v17 = vrot.slane %v70_v15, 1  ;;  %v84_v18 = vld [vmem:[#allocation0 + $0x1f] ss:$-1 sm:$0xff] }
   0xb   :  { %81 = vst [vmem:[#allocation1 + $0x8] sm:$0xff] %v80_v13  ;;  %v85_v20 = vrot.slane %v84_v18, 1  ;;  %v98_v21 = vld [vmem:[#allocation0 + $0x2f] ss:$-1 sm:$0xff] }
   0xc   :  { %75 = vst.msk [vmem:[#allocation1] sm:$0xff] %vm74_vm0, %v71_v17  ;;  %v99_v23 = vrot.slane %v98_v21, 1  ;;  %v112_v25 = vld [vmem:[#allocation0 + $0x3f] ss:$-1 sm:$0xff] }
   0xd   :  { %89 = vst.msk [vmem:[#allocation1 + $0x8] sm:$0xff] %vm74_vm0, %v85_v20  ;;  %v113_v26 = vrot.slane %v112_v25, 1  ;;  %v126_v27 = vld [vmem:[#allocation0 + $0x4f] ss:$-1 sm:$0xff] }
   0xe   :  { %95 = vst [vmem:[#allocation1 + $0x10] sm:$0xff] %v94_v19  ;;  %v140_v30 = vld [vmem:[#allocation0 + $0x5f] ss:$-1 sm:$0xff]  ;;  %v127_v31 = vrot.slane %v126_v27, 1 }
   0xf   :  { %103 = vst.msk [vmem:[#allocation1 + $0x10] sm:$0xff] %vm74_vm0, %v99_v23  ;;  %v154_v34 = vld [vmem:[#allocation0 + $0x6f] ss:$-1 sm:$0xff]  ;;  %v141_v35 = vrot.slane %v140_v30, 1 }
  0x10   :  { %109 = vst [vmem:[#allocation1 + $0x18] sm:$0xff] %v108_v24  ;;  %v168_v38 = vld [vmem:[#allocation0 + $0x7f] ss:$-1 sm:$0xff]  ;;  %v155_v39 = vrot.slane %v154_v34, 1 }
  0x11   :  { %117 = vst.msk [vmem:[#allocation1 + $0x18] sm:$0xff] %vm74_vm0, %v113_v26  ;;  %v169_v41 = vrot.slane %v168_v38, 1 }
  0x12   :  { %123 = vst [vmem:[#allocation1 + $0x20] sm:$0xff] %v122_v29 }
  0x13   :  { %131 = vst.msk [vmem:[#allocation1 + $0x20] sm:$0xff] %vm74_vm0, %v127_v31  ;;  %v216_v42 = vld [vmem:[#allocation1] sm:$0xff] }
  0x14   :  { %137 = vst [vmem:[#allocation1 + $0x28] sm:$0xff] %v136_v33  ;;  %v218_v43 = vld [vmem:[#allocation1 + $0x8] sm:$0xff] }
  0x15   :  { %145 = vst.msk [vmem:[#allocation1 + $0x28] sm:$0xff] %vm74_vm0, %v141_v35 }
  0x16   :  { %151 = vst [vmem:[#allocation1 + $0x30] sm:$0xff] %v150_v37  ;;  %v220_v44 = vld [vmem:[#allocation1 + $0x10] sm:$0xff] }
  0x17   :  { %159 = vst.msk [vmem:[#allocation1 + $0x30] sm:$0xff] %vm74_vm0, %v155_v39 }
  0x18   :  { %165 = vst [vmem:[#allocation1 + $0x38] sm:$0xff] %v164_v40  ;;  %v222_v45 = vld [vmem:[#allocation1 + $0x18] sm:$0xff] }
  0x19   :  { %173 = vst.msk [vmem:[#allocation1 + $0x38] sm:$0xff] %vm74_vm0, %v169_v41 }
  0x1a   :  { %217 = vst [vmem:[%s332_s1] sm:$0xff] %v216_v42  ;;  %v224_v46 = vld [vmem:[#allocation1 + $0x20] sm:$0xff] }
  0x1b   :  { %219 = vst [vmem:[%s332_s1 + $0x8] sm:$0xff] %v218_v43 }
  0x1c   :  { %221 = vst [vmem:[%s332_s1 + $0x10] sm:$0xff] %v220_v44  ;;  %v226_v47 = vld [vmem:[#allocation1 + $0x28] sm:$0xff] }
  0x1d   :  { %223 = vst [vmem:[%s332_s1 + $0x18] sm:$0xff] %v222_v45 }
  0x1e   :  { %225 = vst [vmem:[%s332_s1 + $0x20] sm:$0xff] %v224_v46  ;;  %v228_v48 = vld [vmem:[#allocation1 + $0x30] sm:$0xff] }
  0x1f   :  { %227 = vst [vmem:[%s332_s1 + $0x28] sm:$0xff] %v226_v47 }
  0x20   :  { %229 = vst [vmem:[%s332_s1 + $0x30] sm:$0xff] %v228_v48  ;;  %v230_v49 = vld [vmem:[#allocation1 + $0x38] sm:$0xff] }
  0x21   :  { %231 = vst [vmem:[%s332_s1 + $0x38] sm:$0xff] %v230_v49 }

// kernel: fourier_unit_forward.1
= control target key start
LH: loop header
LB: loop body
LE: loop exit
PB: predicated region body
PF: predicated region fallthrough
CT: control target
= control target key end

     0   :  { %s631_s18 = smov 0   ;;  %s633_s19 = smov 0   ;;  %s680_s0 = inlined_call_operand.vmem [shape: f32[2,4,144], index: 0, kind: input, shape index: {}]   ;;  %s681_s1 = inlined_call_operand.vmem [shape: f32[2,4,144], index: 1, kind: input, shape index: {}]   ;;  %s682_s2 = inlined_call_operand.vmem [shape: f32[8,4], index: 2, kind: input, shape index: {}]   ;;  %s683_s3 = inlined_call_operand.vmem [shape: f32[8,4], index: 3, kind: input, shape index: {}]   ;;  %s684_s4 = inlined_call_operand.vmem [shape: f32[8,1], index: 4, kind: input, shape index: {}]   ;;  %s685_s5 = inlined_call_operand.vmem [shape: f32[2,8,144], index: 5, kind: output, shape index: {}]  }
   0x1   :  { %s635_s20 = smov 0  }
   0x2 LB: > { %s27_s21 = sadd.s32 1, %s594_s19  ;;  %p530_p0 = scmp.ge.s32.totalorder %s598_s20, 1  ;;  %s598_s20 = sphi %s635_s20, %s15_s20   ;;  %s594_s19 = sphi %s633_s19, %s687_s19   ;;  %s590_s18 = sphi %s631_s18, %s686_s18  }
   0x3   : > { %p29_p1 = scmp.ge.s32.totalorder %s27_s21, 2  ;;  %p225_p2 = scmp.lt.s32.totalorder %s598_s20, 3 }
   0x5   : > { %s689_s21 = smov (%p29_p1, %s27_s21), 0  ;;  %p226_p3 = pnand %p530_p0, %p225_p2 }
   0x6   : > { %p271_p4 = scmp.lt.s32.totalorder (!%p226_p3), %s590_s18, 1 }
   0x7   : > { %229 = sbr.rel (%p226_p3) target bundleno = 173 (0xad), region = 40 }
   0xc   : > { %v600_v0 = vmov 0   ;;  %v408_v1 = vld [vmem:[%s684_s4] sm:$0xff]  ;;  %s691_s18 = smov (!%p271_p4, %s590_s18), 1  ;;  %vm312_vm0 = vcmask 1043456   ;;  %vm308_vm1 = vcmask 31744   ;;  %vm419_vm2 = vcmask 130048  }
   0xd   : > { %575 = vset.pattern.permute.xlu0 %v600_v0  ;;  %s547_s24 = sshll.u32 %s691_s18, 3  ;;  %v302_v4 = vld [vmem:[%s683_s3] sm:$0xff]  ;;  %s549_s10 = sshll.u32 %s691_s18, 4 }
   0xe   : > { %411 = vperm.xlu0 %575, %v408_v1   ;;  %s288_s27 = scalar_lea.vmem %s681_s1, %s547_s24  ;;  %s278_s30 = scalar_lea.vmem %s680_s0, %s547_s24  ;;  %v300_v7 = vld [vmem:[%s682_s2] sm:$0xff] }
   0xf   : > { %v303_v2 = vld [vmem:[%s288_s27] sm:$0xff]  ;;  %s298_s13 = scalar_lea.vmem %s685_s5, %s549_s10 }
  0x10   : > { %305 = vst [vmem:[#allocation1] ss:$2 sm:$0xff] %v303_v2  ;;  %v301_v3 = vld [vmem:[%s278_s30] sm:$0xff] }
  0x17   : > { %v306_v5 = vld.sshfl [vmem:[#allocation1] sm:$0xff pattern:$0x75316420]  ;;  %v307_v6 = vld.sshfl [vmem:[#allocation1 + $0x8] sm:$0xff pattern:$0x75316420] }
  0x18   : > { %358 = vst [vmem:[#allocation1] ss:$2 sm:$0xff] %v301_v3  ;;  %537 = vmatpush.msk.msra.mxu0 %vm312_vm0, %v306_v5  ;;  %539 = vmatpush.msk.msra.mxu1 %vm312_vm0, %v307_v6 }
  0x19   : > { %538 = vmatmul.msk.f32.vlgmr.msra.gmra.mxu0 %vm308_vm1, %v302_v4  ;;  %540 = vmatmul.msk.f32.vlgmr.msra.gmra.mxu1 %vm308_vm1, %v302_v4 }
  0x1f   : > { %v359_v8 = vld.sshfl [vmem:[#allocation1] sm:$0xff pattern:$0x75316420]  ;;  %v360_v9 = vld.sshfl [vmem:[#allocation1 + $0x8] sm:$0xff pattern:$0x75316420] }
  0x20   : > { %541 = vmatpush.msk.msra.mxu2 %vm312_vm0, %v359_v8  ;;  %543 = vmatpush.msk.msra.mxu3 %vm312_vm0, %v360_v9 }
  0x21   : > { %542 = vmatmul.msk.f32.vlgmr.msra.gmra.mxu2 %vm308_vm1, %v300_v7  ;;  %544 = vmatmul.msk.f32.vlgmr.msra.gmra.mxu3 %vm308_vm1, %v300_v7 }
  0x80   : > { %v412_v12 = vpop.permute.xlu0 %411 }
  0x96   : > { %v334_v10 = vpop.f32.mrf.mxu0  ;;  %v354_v11 = vpop.f32.mrf.mxu1 }
  0xa4   : > { %v385_v13 = vpop.f32.mrf.mxu2  ;;  %v405_v14 = vpop.f32.mrf.mxu3 }
  0xa5   : > { %v386_v15 = vadd.f32 %v385_v13, %v334_v10  ;;  %v406_v16 = vadd.f32 %v405_v14, %v354_v11 }
  0xa7   : > { %v414_v17 = vadd.f32 %v412_v12, %v386_v15  ;;  %v415_v18 = vadd.f32 %v412_v12, %v406_v16 }
  0xa9   : > { %v416_v19 = vmax.f32 %v414_v17, 0.0  ;;  %v417_v20 = vmax.f32 %v415_v18, 0.0 }
  0xab   : > { %418 = vst [vmem:[%s298_s13] sm:$0xff] %v416_v19 }
  0xac   : > { %420 = vst.msk [vmem:[%s298_s13 + $0x8] sm:$0xff] %vm419_vm2, %v417_v20 }
  0xad PF: > { %s15_s20 = sadd.s32 1, %s598_s20   ;;  %s686_s18 = smov %s594_s19 }
  0xae   : > { %p12_p5 = scmp.ge.s32.totalorder %s15_s20, 4   ;;  %s687_s19 = smov %s689_s21 }
  0xb0   :  { %14 = sbr.rel (!%p12_p5) target bundleno = 2 (0x2), region = 73 }

</bundles_post_ra>
